<compile_context>
chip_gen: v7x
topology: tpu7x:2x2x1
jax: 0.10.0
libtpu: 0.0.40
codegen_flags: <defaults>
</compile_context>

<pallas_src>
import jax
import jax.numpy as jnp
from jax.experimental import pallas as pl
from jax.experimental.pallas import tpu as pltpu

LANES = 128
SUBLANES = 8
TARGET_BLOCK_BYTES = 4 << 20  # ~4 MiB streaming block per operand


def _round_up(v: int, m: int) -> int:
    return ((v + m - 1) // m) * m


def _num_tensorcores() -> int:
    """Best-effort TensorCore count per device (v7x = 2, v5e/v6e = 1)."""
    try:
        info = pltpu.get_tpu_info()
        for attr in ("num_cores", "core_count", "tensorcore_count", "num_tensorcores"):
            v = getattr(info, attr, None)
            if isinstance(v, int) and v > 0:
                return v
    except Exception:
        pass
    try:
        dev = jax.devices()[0]
        for attr in ("num_cores", "core_count"):
            v = getattr(dev, attr, None)
            if isinstance(v, int) and v > 0:
                return v
        kind = str(getattr(dev, "device_kind", "")).lower()
        if "v7" in kind or "7x" in kind:
            return 2
    except Exception:
        pass
    return 1


def _make_spact_kernel(alpha: float):
    def kernel(x_ref, o_ref):
        x = x_ref[...].astype(jnp.float32)
        t = jnp.tanh(x)  # EUP slot (transcendental), off the VALU critical path
        # alpha*x + (1-alpha)*tanh(x) == t + alpha*(x - t): 1 mul + 1 sub + 1 add
        o_ref[...] = (t + alpha * (x - t)).astype(o_ref.dtype)

    return kernel


def _spact_2d(x2d: jax.Array, alpha: float) -> jax.Array:
    """SPAct over a lane-dense (rows, 128) slab."""
    rows, _ = x2d.shape
    dtype = x2d.dtype
    itemsize = jnp.dtype(dtype).itemsize

    # Sublane packing multiple for this dtype (8 for f32, 16 for bf16, 32 for int8/fp8).
    sub = max(SUBLANES, 32 // max(1, itemsize))

    # Byte-sized streaming block, rounded down to the packing multiple.
    tr_cap = max(sub, (TARGET_BLOCK_BYTES // (LANES * itemsize)) // sub * sub)

    ncores = _num_tensorcores()
    if ncores > 1:
        # >= 2 grid steps per TensorCore so each core keeps double-buffered
        # prefetch/writeback overlap after megacore sharding (v7x).
        min_steps = 2 * ncores
        per_step_cap = _round_up(pl.cdiv(rows, min_steps), sub)
        tr = max(sub, min(tr_cap, per_step_cap))
    else:
        # Single-TC chip (v5e/v6e): never shrink the block just to force a split.
        tr = max(sub, min(tr_cap, _round_up(rows, sub)))

    grid = pl.cdiv(rows, tr)
    n = rows * LANES

    return pl.pallas_call(
        _make_spact_kernel(alpha),
        out_shape=jax.ShapeDtypeStruct((rows, LANES), dtype),
        grid=(grid,),
        in_specs=[pl.BlockSpec((tr, LANES), lambda i: (i, 0))],
        out_specs=pl.BlockSpec((tr, LANES), lambda i: (i, 0)),
        compiler_params=pltpu.CompilerParams(
            dimension_semantics=("parallel",),
            # 2 operands x 2 buffers x ~4 MiB = 16 MiB; raise v5e's 16 MiB default
            # scoped-VMEM limit and stay inside v7x's 64 MiB physical VMEM.
            vmem_limit_bytes=32 * 1024 * 1024,
        ),
        cost_estimate=pl.CostEstimate(
            flops=3 * n,
            transcendentals=n,
            bytes_accessed=2 * n * itemsize,
        ),
    )(x2d)


def spact(x: jax.Array, alpha: float = 0.5) -> jax.Array:
    """Applies SPAct elementwise. Works on arbitrary-shaped float arrays."""
    alpha = float(alpha)  # static hyperparameter, baked into the kernel
    orig_shape = x.shape
    n = x.size
    if n == 0:
        return x

    rem = n % LANES
    n_main = n - rem

    if n_main == 0:
        # Fewer than 128 elements: a kernel launch isn't worth it.
        return (alpha * x + (1.0 - alpha) * jnp.tanh(x)).astype(x.dtype)

    x_flat = jnp.reshape(x, (-1,))  # contiguous reshape: free

    if rem == 0:
        out2d = _spact_2d(jnp.reshape(x_flat, (-1, LANES)), alpha)
        return jnp.reshape(out2d, orig_shape)

    # Misaligned tail (< 128 elements): kernel handles the lane-aligned prefix,
    # plain jnp handles the tiny tail, stitched once. Avoids the whole-array
    # pad + whole-output slice round trips of the naive padding approach.
    # TODO(synk): a fully copy-free misaligned path would need pl.ANY + manual DMA.
    main2d = _spact_2d(jnp.reshape(x_flat[:n_main], (-1, LANES)), alpha)
    tail = x_flat[n_main:]
    tail_out = (alpha * tail + (1.0 - alpha) * jnp.tanh(tail)).astype(x.dtype)
    out_flat = jnp.concatenate([jnp.reshape(main2d, (-1,)), tail_out])
    return jnp.reshape(out_flat, orig_shape)


if __name__ == "__main__":
    key = jax.random.PRNGKey(0)
    # NCHW input, as PyTorch conv-style tensors: batch=2, channels=4, spatial=16x16
    x = jax.random.normal(key, (2, 4, 16, 16), dtype=jnp.float32)
    alpha = 0.5

    out = spact(x, alpha)
    out = jax.block_until_ready(out)

    # Reference check in plain JAX.
    ref = alpha * x + (1.0 - alpha) * jnp.tanh(x)
    assert out.shape == x.shape and out.dtype == x.dtype
    assert jnp.allclose(out, ref, atol=1e-5, rtol=1e-5)

    print("KERNEL_OK")
</pallas_src>

<mosaic_0001>
module attributes {stable_mosaic.version = 11 : i64} {
  func.func @kernel(%arg0: i32, %arg1: memref<16x128xf32, #tpu.memory_space<vmem>>, %arg2: memref<16x128xf32, #tpu.memory_space<vmem>>) attributes {dimension_semantics = [#tpu.dimension_semantics<parallel>], iteration_bounds = array<i64: 1>, scalar_prefetch = 0 : i64, scratch_operands = 0 : i64, tpu.core_type = #tpu.core_type<tc>, window_params = [{transform_indices = @transform_0, window_bounds = array<i64: 16, 128>}, {transform_indices = @transform_1, window_bounds = array<i64: 16, 128>}]} {
    %c0 = arith.constant 0 : index
    %c0_0 = arith.constant 0 : index
    %0 = vector.load %arg1[%c0, %c0_0] : memref<16x128xf32, #tpu.memory_space<vmem>>, vector<16x128xf32>
    %1 = math.tanh %0 : vector<16x128xf32>
    %2 = arith.subf %0, %1 : vector<16x128xf32>
    %cst = arith.constant 5.000000e-01 : f32
    %3 = vector.broadcast %cst : f32 to vector<16x128xf32>
    %4 = arith.mulf %3, %2 : vector<16x128xf32>
    %5 = arith.addf %1, %4 : vector<16x128xf32>
    %c0_1 = arith.constant 0 : index
    %c0_2 = arith.constant 0 : index
    %6 = vector.load %arg2[%c0_1, %c0_2] : memref<16x128xf32, #tpu.memory_space<vmem>>, vector<16x128xf32>
    tpu.vector_store %arg2[%c0_1, %c0_2], %5 {strides = array<i32>} : memref<16x128xf32, #tpu.memory_space<vmem>>, vector<16x128xf32>,
    return
  }
  func.func @transform_0(%arg0: i32) -> (i32, i32) {
    %c0_i32 = arith.constant 0 : i32
    %c0_i32_0 = arith.constant 0 : i32
    return %arg0, %c0_i32 : i32, i32
  }
  func.func @transform_1(%arg0: i32) -> (i32, i32) {
    %c0_i32 = arith.constant 0 : i32
    %c0_i32_0 = arith.constant 0 : i32
    return %arg0, %c0_i32 : i32, i32
  }
}

</mosaic_0001>

<bundles_post_ra>
// kernel: tpu_custom_call.1
= control target key start
LH: loop header
LB: loop body
LE: loop exit
PB: predicated region body
PF: predicated region fallthrough
CT: control target
= control target key end

     0   :  { %6 = vsyncpa [#allocation3], 0  ;;  %s152_s0 = inlined_call_operand.hbm [shape: f32[16,128], index: 0, kind: input, shape index: {}]   ;;  %s153_s1 = inlined_call_operand.hbm [shape: f32[16,128], index: 1, kind: output, shape index: {}]  }
   0x1   :  { %7 = vsyncpa [#allocation4], 0  ;;  %s108_s6 = smov [#allocation2]   ;;  %s60_s10 = scalar_lea.hbm %s152_s0, 256 }
   0x2   :  { %s13_s7 = sshll.u32 %s108_s6, 4  ;;  %p61_p0 = scmp.ne.s32.totalorder %s152_s0, %s60_s10  ;;  %s14_s7 = int_to_ptr.vmem [resolvable:$true] %s13_s7 }
   0x3   :  { %p64_p1 = scmp.lt.u32.totalorder %s60_s10, %s152_s0 }
   0x5   :  { %p66_p2 = pnand %p64_p1, %p61_p0 }
   0x7   :  { %69 = shalt.err (!%p66_p2)
}
   0x8   :  { %s70_s15 = scalar_lea.vmem %s14_s7, 256  ;;  %p75_p4 = scmp.lt.s32.totalorder %s14_s7, %s14_s7 }
   0x9   :  { %p71_p3 = scmp.ne.s32.totalorder %s14_s7, %s70_s15  ;;  %p76_p5 = scmp.lt.s32.totalorder %s70_s15, %s70_s15 }
   0xb   :  { %p77_p6 = por %p76_p5, %p75_p4 }
   0xd   :  { %p78_p7 = pnand %p77_p6, %p71_p3 }
   0xf   :  { %81 = shalt.err (!%p78_p7)
}
  0x10   :  { %s109_s16 = smov 128   ;;  %s110_s17 = smov 8  }
  0x11   :  { %19 = dma.hbm_to_vmem [thread:$0]  %s152_s0, 256, %s14_s7, [#allocation3], %s109_s16, %s109_s16, %s110_s17  }
  0x12   :  { %104 = dma.done.wait [#allocation3], 256  }
  0x13   :  { %105 = vsyncadd [#allocation3], 4294967040  ;;  %v23_v0 = vld [vmem:[#allocation2] sm:$0xff]  ;;  %v24_v1 = vld [vmem:[#allocation2 + $0x8] sm:$0xff]  ;;  %s111_s20 = smov [#allocation5]  }
  0x14   :  { %56 = vtanh.f32 %v23_v0  ;;  %s40_s21 = sshll.u32 %s111_s20, 4  ;;  %s41_s21 = int_to_ptr.vmem [resolvable:$true] %s40_s21 }
  0x15   :  { %58 = vtanh.f32 %v24_v1  ;;  %s82_s0 = scalar_lea.vmem %s41_s21, 256  ;;  %p87_p9 = scmp.lt.s32.totalorder %s41_s21, %s41_s21 }
  0x16   :  { %p83_p8 = scmp.ne.s32.totalorder %s41_s21, %s82_s0  ;;  %p88_p10 = scmp.lt.s32.totalorder %s82_s0, %s82_s0 }
  0x18   :  { %p89_p11 = por %p88_p10, %p87_p9 }
  0x1a   :  { %p90_p12 = pnand %p89_p11, %p83_p8 }
  0x1e   :  { %v57_v2 = vpop.eup %56 }
  0x1f   :  { %v59_v3 = vpop.eup %58  ;;  %v27_v4 = vsub.f32 %v23_v0, %v57_v2 }
  0x20   :  { %v28_v5 = vsub.f32 %v24_v1, %v59_v3 }
  0x21   :  { %v29_v6 = vmul.f32 0.5, %v27_v4 }
  0x22   :  { %v30_v7 = vmul.f32 0.5, %v28_v5 }
  0x23   :  { %v31_v8 = vadd.f32 %v57_v2, %v29_v6 }
  0x24   :  { %v32_v9 = vadd.f32 %v59_v3, %v30_v7 }
  0x25   :  { %33 = vst [vmem:[#allocation5] sm:$0xff] %v31_v8 }
  0x26   :  { %34 = vst [vmem:[#allocation5 + $0x8] sm:$0xff] %v32_v9 }
  0x27   :  { %93 = shalt.err (!%p90_p12)
}
  0x28   :  { %s94_s24 = scalar_lea.hbm %s153_s1, 256 }
  0x29   :  { %p95_p13 = scmp.ne.s32.totalorder %s153_s1, %s94_s24  ;;  %p98_p0 = scmp.lt.u32.totalorder %s94_s24, %s153_s1 }
  0x2b   :  { %p100_p1 = pnand %p98_p0, %p95_p13 }
  0x2d   :  { %103 = shalt.err (!%p100_p1)
}
  0x2e   :  { %46 = dma.vmem_to_hbm [thread:$0]  %s41_s21, 256, %s153_s1, [#allocation4], %s109_s16, %s109_s16, %s110_s17  }
  0x2f   :  { %106 = dma.done.wait [#allocation4], 256  }
  0x30   :  { %107 = vsyncadd [#allocation4], 4294967040 }
  0x31   :  { %50 = vsyncpa [#allocation3], 1 }
  0x32   :  { %51 = vsyncpa [#allocation4], 1 }

</bundles_post_ra>
